<compile_context>
chip_gen: v5e
topology: v5e:2x2
jax: 0.10.0
libtpu: 0.0.40
codegen_flags: <defaults>
</compile_context>

<pallas_src>
import jax
import jax.numpy as jnp
from jax.experimental import pallas as pl
from jax.experimental.pallas import tpu as pltpu


def _element_scale_kernel(x_ref, scale_ref, o_ref):
    # x_ref:     (1, C, TILE_HW) block
    # scale_ref: (1, C, 1)       per-channel scale, broadcast along lanes
    o_ref[...] = (x_ref[...] * scale_ref[...]).astype(o_ref.dtype)


def _choose_tile_hw(C, HW, dtype_bytes, block_budget_bytes=2 * 1024 * 1024):
    """Pick a lane-dense HW tile that keeps per-block bytes <= budget."""
    if HW <= 128:
        # Full-extent block is always legal (and there is nothing to tile).
        return HW
    # Max lanes allowed by the per-block byte budget, rounded to 128.
    max_lanes_by_vmem = (block_budget_bytes // max(1, C * dtype_bytes)) // 128 * 128
    max_lanes_by_vmem = max(128, max_lanes_by_vmem)
    # Sweet spot per measured roofline data: 512-4096 lanes.
    tile = min(HW, 4096, max_lanes_by_vmem)
    tile = max(128, (tile // 128) * 128)
    return tile


def element_scale(x, scale):
    """x: (N, C, H, W) array; scale: (1, C, 1, 1) array. Returns x * scale."""
    N, C, H, W = x.shape
    HW = H * W

    x3 = x.reshape(N, C, HW)
    # Match dtypes up front so the VPU path stays packed (bf16) and the store
    # into an x.dtype output is exact.
    s3 = scale.reshape(1, C, 1).astype(x.dtype)

    tile_hw = _choose_tile_hw(C, HW, jnp.dtype(x.dtype).itemsize)
    grid = (N, pl.cdiv(HW, tile_hw))

    out = pl.pallas_call(
        _element_scale_kernel,
        out_shape=jax.ShapeDtypeStruct((N, C, HW), x.dtype),
        grid_spec=pltpu.PrefetchScalarGridSpec(
            num_scalar_prefetch=0,
            grid=grid,
            in_specs=[
                pl.BlockSpec((1, C, tile_hw), lambda n, h: (n, 0, h)),
                pl.BlockSpec((1, C, 1), lambda n, h: (0, 0, 0)),
            ],
            out_specs=pl.BlockSpec((1, C, tile_hw), lambda n, h: (n, 0, h)),
        ),
        compiler_params=pltpu.CompilerParams(
            dimension_semantics=("parallel", "parallel"),
        ),
    )(x3, s3)
    return out.reshape(N, C, H, W)


def init_element_scale_params(embed_dims, init_value=0.0, dtype=jnp.float32):
    """Matches nn.Parameter(init_value * ones((1, C, 1, 1)))."""
    return init_value * jnp.ones((1, embed_dims, 1, 1), dtype=dtype)


if __name__ == "__main__":
    key = jax.random.PRNGKey(0)

    # --- Test 1: f32, module-default-ish small shapes -----------------------
    N, C, H, W = 2, 4, 16, 16
    x = jax.random.normal(key, (N, C, H, W), dtype=jnp.float32)
    # Nonzero init so the scale path is actually exercised (default is 0.0).
    scale = init_element_scale_params(C, init_value=0.5)

    y = element_scale(x, scale)
    jax.block_until_ready(y)

    y_ref = x * scale
    assert y.shape == x.shape and y.dtype == x.dtype
    assert jnp.allclose(y, y_ref, atol=1e-6, rtol=1e-6)

    # --- Test 2: bf16 activations with f32 learnable scale ------------------
    key2 = jax.random.PRNGKey(1)
    N2, C2, H2, W2 = 2, 8, 32, 32
    x2 = jax.random.normal(key2, (N2, C2, H2, W2), dtype=jnp.bfloat16)
    scale2 = 0.25 * jnp.ones((1, C2, 1, 1), dtype=jnp.float32) \
        + 0.01 * jnp.arange(C2, dtype=jnp.float32).reshape(1, C2, 1, 1)

    y2 = element_scale(x2, scale2)
    jax.block_until_ready(y2)

    y2_ref = x2 * scale2.astype(x2.dtype)
    assert y2.shape == x2.shape and y2.dtype == x2.dtype
    assert jnp.allclose(
        y2.astype(jnp.float32), y2_ref.astype(jnp.float32), atol=1e-2, rtol=1e-2
    )

    print("KERNEL_OK")
</pallas_src>

<mosaic_0001>
module attributes {stable_mosaic.version = 11 : i64} {
  func.func @_element_scale_kernel(%arg0: i32, %arg1: i32, %arg2: memref<1x4x256xf32, #tpu.memory_space<vmem>>, %arg3: memref<1x4x1xf32, #tpu.memory_space<vmem>>, %arg4: memref<1x4x256xf32, #tpu.memory_space<vmem>>) attributes {dimension_semantics = [#tpu.dimension_semantics<parallel>, #tpu.dimension_semantics<parallel>], iteration_bounds = array<i64: 2, 1>, scalar_prefetch = 0 : i64, scratch_operands = 0 : i64, tpu.core_type = #tpu.core_type<tc>, window_params = [{transform_indices = @transform_0, window_bounds = array<i64: 1, 4, 256>}, {pipeline_mode = #tpu.pipeline_mode<synchronous>, transform_indices = @transform_1, window_bounds = array<i64: 1, 4, 1>}, {transform_indices = @transform_2, window_bounds = array<i64: 1, 4, 256>}]} {
    %c0 = arith.constant 0 : index
    %c0_0 = arith.constant 0 : index
    %c0_1 = arith.constant 0 : index
    %0 = vector.load %arg2[%c0, %c0_0, %c0_1] : memref<1x4x256xf32, #tpu.memory_space<vmem>>, vector<1x4x256xf32>
    %c0_2 = arith.constant 0 : index
    %c0_3 = arith.constant 0 : index
    %c0_4 = arith.constant 0 : index
    %1 = vector.load %arg3[%c0_2, %c0_3, %c0_4] : memref<1x4x1xf32, #tpu.memory_space<vmem>>, vector<1x4x1xf32>
    %2 = vector.broadcast %1 : vector<1x4x1xf32> to vector<1x4x256xf32>
    %3 = arith.mulf %0, %2 : vector<1x4x256xf32>
    %c0_5 = arith.constant 0 : index
    %c0_6 = arith.constant 0 : index
    %c0_7 = arith.constant 0 : index
    %4 = vector.load %arg4[%c0_5, %c0_6, %c0_7] : memref<1x4x256xf32, #tpu.memory_space<vmem>>, vector<1x4x256xf32>
    tpu.vector_store %arg4[%c0_5, %c0_6, %c0_7], %3 {strides = array<i32>} : memref<1x4x256xf32, #tpu.memory_space<vmem>>, vector<1x4x256xf32>,
    return
  }
  func.func @transform_0(%arg0: i32, %arg1: i32) -> (i32, i32, i32) {
    %c0_i32 = arith.constant 0 : i32
    %c0_i32_0 = arith.constant 0 : i32
    return %arg0, %c0_i32, %arg1 : i32, i32, i32
  }
  func.func @transform_1(%arg0: i32, %arg1: i32) -> (i32, i32, i32) {
    %c0_i32 = arith.constant 0 : i32
    %c0_i32_0 = arith.constant 0 : i32
    %c0_i32_1 = arith.constant 0 : i32
    %c0_i32_2 = arith.constant 0 : i32
    return %c0_i32, %c0_i32_0, %c0_i32_1 : i32, i32, i32
  }
  func.func @transform_2(%arg0: i32, %arg1: i32) -> (i32, i32, i32) {
    %c0_i32 = arith.constant 0 : i32
    %c0_i32_0 = arith.constant 0 : i32
    return %arg0, %c0_i32, %arg1 : i32, i32, i32
  }
}

</mosaic_0001>

<bundles_post_ra>
// kernel: tpu_custom_call.1
= control target key start
LH: loop header
LB: loop body
LE: loop exit
PB: predicated region body
PF: predicated region fallthrough
CT: control target
= control target key end

     0   :  { %7 = vsyncpa [#allocation3], 0  ;;  %s634_s0 = inlined_call_operand.hbm [shape: f32[2,4,256], index: 0, kind: input, shape index: {}]   ;;  %s635_s1 = inlined_call_operand.vmem [shape: f32[1,4,1], index: 1, kind: input, shape index: {}]   ;;  %s636_s2 = inlined_call_operand.hbm [shape: f32[2,4,256], index: 2, kind: output, shape index: {}]  }
   0x1   :  { %9 = vsyncpa [#allocation3 + $0x1], 0 }
   0x2   :  { %10 = vsyncpa [#allocation4], 0 }
   0x3   :  { %12 = vsyncpa [#allocation4 + $0x1], 0  ;;  %s511_s9 = smov 0   ;;  %s513_s10 = smov 0  }
   0x4   :  { %s515_s11 = smov 0   ;;  %s517_s12 = smov 0  }
   0x5   :  { %s519_s13 = smov 0   ;;  %s521_s14 = smov 0  }
   0x6 LB: > { %s298_s15 = sadd.s32 4294967295, %s492_s14   ;;  %s299_s16 = sadd.s32 4294967294, %s492_s14   ;;  %s492_s14 = sphi %s521_s14, %s18_s14   ;;  %s488_s13 = sphi %s519_s13, %s645_s13   ;;  %s484_s12 = sphi %s517_s12, %s644_s12   ;;  %s480_s11 = sphi %s515_s11, %s643_s11   ;;  %s476_s10 = sphi %s513_s10, %s642_s10   ;;  %s472_s9 = sphi %s511_s9, %s641_s9  }
   0x7   : > { %s30_s17 = sadd.s32 1, %s488_s13  ;;  %s39_s18 = sadd.s32 1, %s480_s11 }
   0x8   : > { %p32_p0 = scmp.ge.s32.totalorder %s30_s17, 2  ;;  %p46_p1 = scmp.ne.s32.totalorder %s480_s11, %s476_s10 }
   0x9   : > { %p47_p2 = scmp.eq.s32.totalorder %s492_s14, 0  ;;  %p52_p3 = scmp.ne.s32.totalorder %s476_s10, %s472_s9 }
   0xa   : > { %s647_s17 = smov (%p32_p0, %s30_s17), 0  ;;  %p53_p5 = scmp.eq.s32.totalorder %s298_s15, 0 }
   0xb   : > { %p552_p4 = por %p47_p2, %p46_p1  ;;  %s34_s20 = ssub.s32 %s488_s13, %s647_s17 }
   0xc   : > { %p99_p6 = scmp.eq.s32.totalorder %s298_s15, 1  ;;  %p37_p7 = scmp.eq.s32.totalorder %s34_s20, 0 }
   0xd   : > { %p558_p8 = por %p53_p5, %p52_p3  ;;  %p105_p10 = scmp.eq.s32.totalorder %s299_s16, 1 }
   0xe   : > { %p562_p9 = por %p99_p6, %p46_p1  ;;  %p301_p12 = scmp.ge.s32.totalorder %s492_s14, 2 }
   0xf   : > { %s567_s23 = scalar_select %p37_p7, %s480_s11, %s39_s18  }
  0x10   : > { %p569_p11 = por %p105_p10, %p52_p3  ;;  %p327_p13 = scmp.lt.s32.totalorder %s492_s14, 2 }
  0x11   : > { %s128_s25 = sand.u32 1, %s480_s11   ;;  %s313_s27 = sshll.u32 %s488_s13, 3 }
  0x12   : > { %s302_s26 = sshll.u32 %s128_s25, 3  ;;  %s139_s30 = scalar_lea.hbm %s634_s0, %s313_s27 }
  0x13   : > { %s132_s3 = scalar_lea.vmem [#allocation2], %s302_s26  ;;  %s141_s5 = sshll.u32 %s139_s30, 4  ;;  %s142_s5 = int_to_ptr.hbm [resolvable:$true] %s141_s5 }
  0x14   : > { %s143_s4 = sshll.u32 %s132_s3, 4  ;;  %p320_p0 = pnand %p327_p13, %p552_p4  ;;  %s144_s4 = int_to_ptr.vmem [resolvable:$true] %s143_s4 }
  0x15   : > { %p305_p1 = scmp.ge.s32.totalorder %s492_s14, 1  ;;  %p148_p2 = scmp.lt.s32.totalorder %s492_s14, 3 }
  0x16   : > { %s129_s6 = scalar_lea.sflag [#allocation3], %s128_s25 }
  0x17   : > { %322 = dma.hbm_to_vmem [thread:$0]  (!%p320_p0), %s142_s5, 128, %s144_s4, %s129_s6  }
  0x18   : > { %p149_p3 = pnand %p305_p1, %p148_p2 }
  0x19   : > { %s585_s7 = sand.u32 (!%p149_p3), 1, %s476_s10  }
  0x1a   : > { %152 = sbr.rel (%p149_p3) target bundleno = 156 (0x9c), region = 28  ;;  %s306_s8 = sshll.u32 (!%p149_p3), %s585_s7, 3 }
  0x1b   : > { %s155_s15 = scalar_lea.sflag (!%p149_p3), [#allocation3], %s585_s7  ;;  %s158_s16 = scalar_lea.vmem (!%p149_p3), [#allocation2], %s306_s8 }
  0x1f   : > { %463 = dma.done.wait (%p558_p8), %s155_s15, 128  }
  0x20   : > { %465 = vsyncadd (%p558_p8), %s155_s15, 4294967168  ;;  %v494_v0 = vmov 0   ;;  %v183_v1 = vld [vmem:[%s635_s1] sm:$0xf]  ;;  %v495_v2 = vmov 839922192  }
  0x21   : > { %379 = vset.pattern.permute.xlu0 %v494_v0  ;;  %v189_v3 = vunpack.c.l.s4 %v495_v2  ;;  %s314_s20 = sshll.u32 %s484_s12, 3  ;;  %v182_v6 = vld [vmem:[%s158_s16] sm:$0xff]  ;;  %s179_s21 = scalar_lea.vmem [#allocation5], %s306_s8 }
  0x22   : > { %186 = vperm.xlu0 %379, %v183_v1   ;;  %s209_s27 = scalar_lea.hbm %s636_s2, %s314_s20  ;;  %s211_s28 = sshll.u32 %s179_s21, 4  ;;  %s212_s28 = int_to_ptr.vmem [resolvable:$true] %s211_s28 }
  0x23   : > { %v190_v4 = vunpack.c.0.s8 %v189_v3  ;;  %s213_s29 = sshll.u32 %s209_s27, 4  ;;  %s196_s30 = scalar_lea.sflag [#allocation4], %s585_s7  ;;  %s214_s29 = int_to_ptr.hbm [resolvable:$true] %s213_s29 }
  0x24   : > { %s424_s3 = sshra.s32 %s214_s29, 4  ;;  %s430_s6 = scalar_lea.hbm %s636_s2, 16  ;;  %s425_s3 = int_to_ptr.hbm [resolvable:$true] %s424_s3 }
  0x25   : > { %s426_s12 = scalar_lea.hbm %s425_s3, 8  ;;  %p431_p7 = scmp.lt.s32.totalorder %s425_s3, %s636_s2 }
  0x26   : > { %p427_p4 = scmp.ne.s32.totalorder %s425_s3, %s426_s12  ;;  %p432_p8 = scmp.lt.s32.totalorder %s430_s6, %s426_s12 }
  0x28   : > { %p428_p5 = pnand %p427_p4, %p562_p9  ;;  %p433_p10 = por %p432_p8, %p431_p7 }
  0x2a   : > { %p429_p6 = pneg %p428_p5 }
  0x2c   : > { %p434_p13 = pnand %p433_p10, %p429_p6 }
  0x94   : > { %v187_v5 = vpop.permute.xlu0 %186 }
  0x95   : > { %v191_v7 = vperm.slane %v187_v5, %v190_v4 }
  0x97   : > { %v193_v8 = vmul.f32 %v191_v7, %v182_v6 }
  0x99   : > { %194 = vst [vmem:[%s179_s21] sm:$0xff] %v193_v8 }
  0x9a   : > { %437 = shalt.err (!%p434_p13)
}
  0x9b   : > { %317 = dma.vmem_to_hbm [thread:$0]  (%p562_p9), %s212_s28, 128, %s214_s29, %s196_s30  }
  0x9c PF: > { %s225_s7 = sand.u32 1, %s472_s9   ;;  %p324_p0 = pnand %p301_p12, %p569_p11 }
  0x9d   : > { %s226_s16 = scalar_lea.sflag [#allocation4], %s225_s7 }
  0x9e   : > { %p325_p1 = pneg %p324_p0 }
  0xa0   : > { %467 = dma.done.wait (%p325_p1), %s226_s16, 128  }
  0xa1   : > { %469 = vsyncadd (%p325_p1), %s226_s16, 4294967168  ;;  %s18_s14 = sadd.s32 1, %s492_s14   ;;  %s641_s9 = smov %s476_s10 }
  0xa2   : > { %p15_p2 = scmp.ge.s32.totalorder %s18_s14, 4   ;;  %s642_s10 = smov %s480_s11 }
  0xa3   : > { %s643_s11 = smov %s567_s23  ;;  %s644_s12 = smov %s488_s13 }
  0xa4   : > { %s645_s13 = smov %s647_s17  ;;  %17 = sbr.rel (!%p15_p2) target bundleno = 6 (0x6), region = 73 }
  0xa9   :  { %232 = vsyncpa [#allocation3], 1 }
  0xaa   :  { %234 = vsyncpa [#allocation3 + $0x1], 1 }
  0xab   :  { %235 = vsyncpa [#allocation4], 1 }
  0xac   :  { %237 = vsyncpa [#allocation4 + $0x1], 1 }

</bundles_post_ra>
